<compile_context>
chip_gen: v6e
topology: v6e:2x2x1
jax: 0.10.0
libtpu: 0.0.40
codegen_flags: <defaults>
</compile_context>

<pallas_src>
import jax
import jax.numpy as jnp
from jax import lax
from jax.experimental import pallas as pl
from jax.experimental.pallas import tpu as pltpu


def _round_up(x, m):
    return ((x + m - 1) // m) * m


def _pick_config():
    """Generation-aware (tn, tk, vmem_limit_bytes)."""
    try:
        vmem = pltpu.get_tpu_info().vmem_capacity_bytes
    except Exception:
        vmem = 64 << 20
    if vmem >= (100 << 20):          # v5e / v6e: 128 MiB physical VMEM
        return 1024, 4096, 96 << 20
    return 512, 2048, 48 << 20       # v7x (64 MiB per TC) or unknown


# Layout: x tile (TN, D) pre-scaled by sqrt(2*sigma); a_x tile (TN, 1) =
# -sigma*||x||^2; centers^T tile (D, TK) pre-scaled; a_c tile (1, TK) =
# -sigma*||c||^2; w tile as a column (TK, 1); output (TN, 1) f32 accumulator
# resident in VMEM across the K reduction axis.
def rbf_forward_kernel(x_ref, ax_ref, ct_ref, ac_ref, w_ref, o_ref):
    # grid = (N-tile index [parallel], K-tile index [arbitrary / reduction])
    k = pl.program_id(1)

    @pl.when(k == 0)
    def _():
        o_ref[...] = jnp.zeros_like(o_ref)

    # Cross-term on the MXU with the RHS already in native (contraction-on-
    # sublanes, K-on-lanes) layout -- no in-kernel transpose.
    xc = lax.dot_general(
        x_ref[...], ct_ref[...],
        dimension_numbers=(((1,), (0,)), ((), ())),
        preferred_element_type=jnp.float32,
    )                                                    # (TN, TK)

    # exponent = -sigma*||x - c||^2 = x'.c' + (-sigma||x||^2) + (-sigma||c||^2)
    # (x', c' pre-scaled by sqrt(2*sigma)); clamp to <= 0 for numerical safety.
    arg = jnp.minimum(xc + ax_ref[...] + ac_ref[...], 0.0)
    phi = jnp.exp(arg)                                   # EUP (saturating unit)

    # Weighted reduction over this K tile on the MXU, straight into the
    # VMEM-resident output tile.
    o_ref[...] += jnp.dot(phi, w_ref[...], preferred_element_type=jnp.float32)


def rbf_forward(x, centers, w, sigma, *, tn=None, tk=None, vmem_limit=None):
    """Pallas wrapper: x (N, D), centers (K, D), w (K,), sigma scalar -> (N,)."""
    N, D = x.shape
    K = centers.shape[0]

    d_tn, d_tk, d_vmem = _pick_config()
    tn = d_tn if tn is None else tn
    tk = d_tk if tk is None else tk
    vmem_limit = d_vmem if vmem_limit is None else vmem_limit

    # Pad to legal tile extents: sublane axis multiple of 8, lane axis (K in
    # the (N, K) phi tile) multiple of 128. Padded centers get weight 0 so they
    # contribute nothing; padded query rows are sliced off at the end.
    n_pad = _round_up(N, 8)
    k_pad = _round_up(K, 128)

    # Megacore balance: give the parallel N axis at least 2 tiles when N allows
    # it (v7x shards "parallel" over 2 TensorCores; negligible cost elsewhere).
    tn = min(tn, _round_up((n_pad + 1) // 2, 8))
    tk = min(tk, k_pad)
    n_pad = _round_up(n_pad, tn)
    k_pad = _round_up(k_pad, tk)

    # Fold sigma into the operands: scale both sides by sqrt(2*sigma) so the
    # MXU cross-term already carries the 2*sigma factor; the hoisted squared
    # norms then just need a -1/2 factor.
    sigma_f = jnp.asarray(sigma, jnp.float32)
    scale = jnp.sqrt(2.0 * sigma_f)
    xp = jnp.zeros((n_pad, D), jnp.float32).at[:N].set(x.astype(jnp.float32) * scale)
    ctp = jnp.zeros((D, k_pad), jnp.float32).at[:, :K].set(
        (centers.astype(jnp.float32) * scale).T)
    ax = -0.5 * jnp.sum(xp * xp, axis=-1, keepdims=True)       # (n_pad, 1) = -sigma*||x||^2
    ac = -0.5 * jnp.sum(ctp * ctp, axis=0, keepdims=True)      # (1, k_pad) = -sigma*||c||^2
    wp = jnp.zeros((k_pad, 1), jnp.float32).at[:K, 0].set(w.astype(jnp.float32))

    grid = (n_pad // tn, k_pad // tk)
    n_tiles = grid[0]

    cost = pl.CostEstimate(
        flops=int(2 * n_pad * k_pad * (D + 1) + 3 * n_pad * k_pad),
        transcendentals=int(n_pad * k_pad),
        # K-side operands (centers^T, a_c, w) are re-streamed once per N tile.
        bytes_accessed=int(4 * (n_pad * (D + 1)
                                + n_tiles * k_pad * (D + 2)
                                + n_pad)),
    )

    out = pl.pallas_call(
        rbf_forward_kernel,
        out_shape=jax.ShapeDtypeStruct((n_pad, 1), jnp.float32),
        grid=grid,
        in_specs=[
            pl.BlockSpec((tn, D), lambda i, k: (i, 0)),        # x tile (pre-scaled)
            pl.BlockSpec((tn, 1), lambda i, k: (i, 0)),        # a_x tile (hoisted x-norm)
            pl.BlockSpec((D, tk), lambda i, k: (0, k)),        # centers^T tile (lane-dense)
            pl.BlockSpec((1, tk), lambda i, k: (0, k)),        # a_c tile (hoisted c-norm)
            pl.BlockSpec((tk, 1), lambda i, k: (k, 0)),        # w column for MXU dot
        ],
        out_specs=pl.BlockSpec((tn, 1), lambda i, k: (i, 0)),  # resident across K
        compiler_params=pltpu.CompilerParams(
            dimension_semantics=("parallel", "arbitrary"),     # N parallel, K reduction
            vmem_limit_bytes=vmem_limit,
        ),
        cost_estimate=cost,
    )(xp, ax, ctp, ac, wp)
    return out[:N, 0]


# ---------- plain-JAX glue: deterministic parameter setup (mimics fit()) ----------
def _activations_ref(x, centers, sigma):
    d2 = jnp.sum((x[:, None, :] - centers[None, :, :]) ** 2, axis=-1)
    return jnp.exp(-sigma * d2)


def fit_weights(X, Y, sigma, ridge_lambda=0.01):
    # TODO(synk): the torch fit() runs a KFold CV sweep over _LAMBDAS/_SIGMAS with
    # torch.pinverse; here we use a fixed (lambda, sigma) ridge solve as glue.
    H = _activations_ref(X, X, sigma)                    # (K, K)
    A = H.T @ H + ridge_lambda * jnp.eye(X.shape[0], dtype=jnp.float32)
    return jnp.linalg.solve(A, H.T @ Y)                  # (K,)


if __name__ == "__main__":
    key = jax.random.PRNGKey(0)
    k_x, k_train, k_y = jax.random.split(key, 3)

    K, D, N = 16, 8, 8          # K training points = #centers, D features, N query points
    sigma = jnp.float32(0.1)    # stands in for the CV-selected _SIGMAS entry

    X_train = jax.random.normal(k_train, (K, D), dtype=jnp.float32)
    Y_train = jax.random.normal(k_y, (K,), dtype=jnp.float32)
    x_query = jax.random.normal(k_x, (N, D), dtype=jnp.float32)

    centers = X_train                          # self.centers = X
    w = fit_weights(X_train, Y_train, sigma)   # self.w (K,)

    out = jax.block_until_ready(rbf_forward(x_query, centers, w, sigma))

    # correctness check vs plain-JAX reference of the torch forward()
    phi_ref = _activations_ref(x_query, centers, sigma)
    out_ref = jnp.sum(w[None, :] * phi_ref, axis=1)
    assert out.shape == (N,)
    assert jnp.allclose(out, out_ref, atol=1e-4, rtol=1e-4), (out, out_ref)

    print("KERNEL_OK")
</pallas_src>

<mosaic_0001>
module attributes {stable_mosaic.version = 11 : i64} {
  func.func @rbf_forward_kernel(%arg0: i32, %arg1: i32, %arg2: memref<8x8xf32, #tpu.memory_space<vmem>>, %arg3: memref<8x1xf32, #tpu.memory_space<vmem>>, %arg4: memref<8x128xf32, #tpu.memory_space<vmem>>, %arg5: memref<1x128xf32, #tpu.memory_space<vmem>>, %arg6: memref<128x1xf32, #tpu.memory_space<vmem>>, %arg7: memref<8x1xf32, #tpu.memory_space<vmem>>) attributes {dimension_semantics = [#tpu.dimension_semantics<parallel>, #tpu.dimension_semantics<arbitrary>], iteration_bounds = array<i64: 1, 1>, scalar_prefetch = 0 : i64, scratch_operands = 0 : i64, tpu.core_type = #tpu.core_type<tc>, window_params = [{transform_indices = @transform_0, window_bounds = array<i64: 8, 8>}, {transform_indices = @transform_1, window_bounds = array<i64: 8, 1>}, {transform_indices = @transform_2, window_bounds = array<i64: 8, 128>}, {transform_indices = @transform_3, window_bounds = array<i64: 1, 128>}, {transform_indices = @transform_4, window_bounds = array<i64: 128, 1>}, {transform_indices = @transform_5, window_bounds = array<i64: 8, 1>}]} {
    %c0_i32 = arith.constant 0 : i32
    %0 = arith.cmpi eq, %arg1, %c0_i32 : i32
    %1 = arith.extui %0 : i1 to i32
    %c0_i32_0 = arith.constant 0 : i32
    %2 = arith.cmpi ne, %1, %c0_i32_0 : i32
    scf.if %2 {
      %cst_16 = arith.constant 0.000000e+00 : f32
      %20 = vector.broadcast %cst_16 : f32 to vector<8x1xf32>
      %c0_17 = arith.constant 0 : index
      %c0_18 = arith.constant 0 : index
      %21 = vector.load %arg7[%c0_17, %c0_18] : memref<8x1xf32, #tpu.memory_space<vmem>>, vector<8x1xf32>
      tpu.vector_store %arg7[%c0_17, %c0_18], %20 {strides = array<i32>} : memref<8x1xf32, #tpu.memory_space<vmem>>, vector<8x1xf32>,
    } else {
    }
    %c0 = arith.constant 0 : index
    %c0_1 = arith.constant 0 : index
    %3 = vector.load %arg2[%c0, %c0_1] : memref<8x8xf32, #tpu.memory_space<vmem>>, vector<8x8xf32>
    %c0_2 = arith.constant 0 : index
    %c0_3 = arith.constant 0 : index
    %4 = vector.load %arg4[%c0_2, %c0_3] : memref<8x128xf32, #tpu.memory_space<vmem>>, vector<8x128xf32>
    %cst = arith.constant dense<0.000000e+00> : vector<8x128xf32>
    %5 = tpu.matmul %3, %4, %cst {dimension_numbers = #tpu.dot_dimension_numbers<[1], [0], [0], [1], [0, 0, 1, 1], [], []>} : vector<8x8xf32>, vector<8x128xf32>, vector<8x128xf32> -> vector<8x128xf32>
    %c0_4 = arith.constant 0 : index
    %c0_5 = arith.constant 0 : index
    %6 = vector.load %arg3[%c0_4, %c0_5] : memref<8x1xf32, #tpu.memory_space<vmem>>, vector<8x1xf32>
    %7 = vector.broadcast %6 : vector<8x1xf32> to vector<8x128xf32>
    %8 = arith.addf %5, %7 : vector<8x128xf32>
    %c0_6 = arith.constant 0 : index
    %c0_7 = arith.constant 0 : index
    %9 = vector.load %arg5[%c0_6, %c0_7] : memref<1x128xf32, #tpu.memory_space<vmem>>, vector<1x128xf32>
    %10 = vector.broadcast %9 : vector<1x128xf32> to vector<8x128xf32>
    %11 = arith.addf %8, %10 : vector<8x128xf32>
    %cst_8 = arith.constant 0.000000e+00 : f32
    %12 = vector.broadcast %cst_8 : f32 to vector<8x128xf32>
    %13 = arith.minimumf %11, %12 : vector<8x128xf32>
    %14 = math.exp %13 : vector<8x128xf32>
    %c0_9 = arith.constant 0 : index
    %c0_10 = arith.constant 0 : index
    %15 = vector.load %arg7[%c0_9, %c0_10] : memref<8x1xf32, #tpu.memory_space<vmem>>, vector<8x1xf32>
    %c0_11 = arith.constant 0 : index
    %c0_12 = arith.constant 0 : index
    %16 = vector.load %arg6[%c0_11, %c0_12] : memref<128x1xf32, #tpu.memory_space<vmem>>, vector<128x1xf32>
    %cst_13 = arith.constant dense<0.000000e+00> : vector<8x1xf32>
    %17 = tpu.matmul %14, %16, %cst_13 {dimension_numbers = #tpu.dot_dimension_numbers<[1], [0], [0], [1], [0, 0, 1, 1], [], []>} : vector<8x128xf32>, vector<128x1xf32>, vector<8x1xf32> -> vector<8x1xf32>
    %18 = arith.addf %15, %17 : vector<8x1xf32>
    %c0_14 = arith.constant 0 : index
    %c0_15 = arith.constant 0 : index
    %19 = vector.load %arg7[%c0_14, %c0_15] : memref<8x1xf32, #tpu.memory_space<vmem>>, vector<8x1xf32>
    tpu.vector_store %arg7[%c0_14, %c0_15], %18 {strides = array<i32>} : memref<8x1xf32, #tpu.memory_space<vmem>>, vector<8x1xf32>,
    return
  }
  func.func @transform_0(%arg0: i32, %arg1: i32) -> (i32, i32) {
    %c0_i32 = arith.constant 0 : i32
    %c0_i32_0 = arith.constant 0 : i32
    return %arg0, %c0_i32 : i32, i32
  }
  func.func @transform_1(%arg0: i32, %arg1: i32) -> (i32, i32) {
    %c0_i32 = arith.constant 0 : i32
    %c0_i32_0 = arith.constant 0 : i32
    return %arg0, %c0_i32 : i32, i32
  }
  func.func @transform_2(%arg0: i32, %arg1: i32) -> (i32, i32) {
    %c0_i32 = arith.constant 0 : i32
    %c0_i32_0 = arith.constant 0 : i32
    return %c0_i32, %arg1 : i32, i32
  }
  func.func @transform_3(%arg0: i32, %arg1: i32) -> (i32, i32) {
    %c0_i32 = arith.constant 0 : i32
    %c0_i32_0 = arith.constant 0 : i32
    return %c0_i32, %arg1 : i32, i32
  }
  func.func @transform_4(%arg0: i32, %arg1: i32) -> (i32, i32) {
    %c0_i32 = arith.constant 0 : i32
    %c0_i32_0 = arith.constant 0 : i32
    return %arg1, %c0_i32 : i32, i32
  }
  func.func @transform_5(%arg0: i32, %arg1: i32) -> (i32, i32) {
    %c0_i32 = arith.constant 0 : i32
    %c0_i32_0 = arith.constant 0 : i32
    return %arg0, %c0_i32 : i32, i32
  }
}

</mosaic_0001>

<bundles_post_ra>
// kernel: tpu_custom_call.1
= control target key start
LH: loop header
LB: loop body
LE: loop exit
PB: predicated region body
PF: predicated region fallthrough
CT: control target
= control target key end

     0   :  { %vm34_vm0 = vcmask 64512   ;;  %v280_v0 = vmov 0.0   ;;  %vm281_vm1 = vmmov 0   ;;  %v282_v4 = vmov 0   ;;  %s404_s2 = inlined_call_operand.vmem [shape: f32[8,128], index: 2, kind: input, shape index: {}]   ;;  %s405_s0 = inlined_call_operand.vmem [shape: f32[8,8], index: 0, kind: input, shape index: {}]   ;;  %s406_s1 = inlined_call_operand.vmem [shape: f32[8,1], index: 1, kind: input, shape index: {}]   ;;  %s407_s4 = inlined_call_operand.vmem [shape: f32[128,1], index: 4, kind: input, shape index: {}]   ;;  %s408_s5 = inlined_call_operand.vmem [shape: f32[8,1], index: 5, kind: output, shape index: {}]   ;;  %s409_s3 = inlined_call_operand.vmem [shape: f32[1,128], index: 3, kind: input, shape index: {}]  }
   0x1   :  { %234 = vmatprep.subr.mxu0 %v280_v0  ;;  %v27_v1 = vld [vmem:[%s404_s2] sm:$0xff]  ;;  %236 = vmatprep.mubr.msk.f32.mxu0 %vm281_vm1, %v280_v0  ;;  %v135_v5 = vld [vmem:[%s407_s4 + $0x78] sm:$0xff]  ;;  %v134_v6 = vld [vmem:[%s407_s4 + $0x70] sm:$0xff]  ;;  %vm24_vm2 = vcmask 7168  }
   0x2   :  { %v26_v2 = vld [vmem:[%s405_s0] sm:$0xff]  ;;  %235 = vmatpush3.msra.mxu0 %v27_v1  ;;  %277 = vset.pattern.permute.xlu0 %v282_v4  ;;  %v133_v7 = vld [vmem:[%s407_s4 + $0x68] sm:$0xff]  ;;  %v131_v9 = vld [vmem:[%s407_s4 + $0x58] sm:$0xff]  ;;  %25 = vst.msk [vmem:[%s408_s5] sm:$0xff] %vm24_vm2, %v280_v0 }
   0x3   :  { %v28_v3 = vld [vmem:[%s406_s1] sm:$0xff]  ;;  %237 = vmatmul.mubr.msk.f32.vlgmr.msra.gmra.mxu0 %vm34_vm0, %v26_v2  ;;  %239 = vmatprep.subr.mxu1 %v280_v0  ;;  %v130_v10 = vld [vmem:[%s407_s4 + $0x50] sm:$0xff]  ;;  %v129_v11 = vld [vmem:[%s407_s4 + $0x48] sm:$0xff] }
   0x4   :  { %31 = vperm.xlu0 %277, %v28_v3   ;;  %271 = vmatprep.mubr.msk.f32.mxu1 %vm281_vm1, %v280_v0  ;;  %v132_v8 = vld [vmem:[%s407_s4 + $0x60] sm:$0xff]  ;;  %v127_v13 = vld [vmem:[%s407_s4 + $0x38] sm:$0xff]  ;;  %v126_v14 = vld [vmem:[%s407_s4 + $0x30] sm:$0xff] }
   0x5   :  { %240 = vmatpush3.msra.mxu1 %v135_v5  ;;  %v128_v12 = vld [vmem:[%s407_s4 + $0x40] sm:$0xff]  ;;  %v125_v15 = vld [vmem:[%s407_s4 + $0x28] sm:$0xff]  ;;  %v123_v17 = vld [vmem:[%s407_s4 + $0x18] sm:$0xff] }
   0x6   :  { %241 = vmatprep.subr.mxu1 %v280_v0  ;;  %v124_v16 = vld [vmem:[%s407_s4 + $0x20] sm:$0xff]  ;;  %v122_v18 = vld [vmem:[%s407_s4 + $0x10] sm:$0xff]  ;;  %v121_v19 = vld [vmem:[%s407_s4 + $0x8] sm:$0xff] }
   0x7   :  { %242 = vmatpush3.msra.mxu1 %v134_v6  ;;  %v120_v20 = vld [vmem:[%s407_s4] sm:$0xff] }
   0x8   :  { %243 = vmatprep.subr.mxu1 %v280_v0  ;;  %v214_v23 = vld [vmem:[%s409_s3] ss:$0 sm:$0xff] }
   0x9   :  { %244 = vmatpush3.msra.mxu1 %v133_v7  ;;  %v119_v30 = vld [vmem:[%s408_s5] sm:$0xff] }
   0xa   :  { %245 = vmatprep.subr.mxu1 %v280_v0 }
   0xb   :  { %246 = vmatpush3.msra.mxu1 %v132_v8 }
   0xc   :  { %247 = vmatprep.subr.mxu1 %v280_v0 }
   0xd   :  { %248 = vmatpush3.msra.mxu1 %v131_v9 }
   0xe   :  { %249 = vmatprep.subr.mxu1 %v280_v0 }
   0xf   :  { %250 = vmatpush3.msra.mxu1 %v130_v10 }
  0x10   :  { %251 = vmatprep.subr.mxu1 %v280_v0 }
  0x11   :  { %252 = vmatpush3.msra.mxu1 %v129_v11 }
  0x12   :  { %253 = vmatprep.subr.mxu1 %v280_v0 }
  0x13   :  { %254 = vmatpush3.msra.mxu1 %v128_v12 }
  0x14   :  { %255 = vmatprep.subr.mxu1 %v280_v0 }
  0x15   :  { %256 = vmatpush3.msra.mxu1 %v127_v13 }
  0x16   :  { %257 = vmatprep.subr.mxu1 %v280_v0 }
  0x17   :  { %258 = vmatpush3.msra.mxu1 %v126_v14 }
  0x18   :  { %259 = vmatprep.subr.mxu1 %v280_v0 }
  0x19   :  { %260 = vmatpush3.msra.mxu1 %v125_v15 }
  0x1a   :  { %261 = vmatprep.subr.mxu1 %v280_v0 }
  0x1b   :  { %262 = vmatpush3.msra.mxu1 %v124_v16 }
  0x1c   :  { %263 = vmatprep.subr.mxu1 %v280_v0 }
  0x1d   :  { %264 = vmatpush3.msra.mxu1 %v123_v17 }
  0x1e   :  { %265 = vmatprep.subr.mxu1 %v280_v0 }
  0x1f   :  { %266 = vmatpush3.msra.mxu1 %v122_v18 }
  0x20   :  { %267 = vmatprep.subr.mxu1 %v280_v0 }
  0x21   :  { %268 = vmatpush3.msra.mxu1 %v121_v19 }
  0x22   :  { %269 = vmatprep.subr.mxu1 %v280_v0 }
  0x23   :  { %270 = vmatpush3.msra.mxu1 %v120_v20 }
  0x7f   :  { %v32_v21 = vpop.permute.xlu0 %31 }
  0xc3   :  { %v104_v22 = vpop.f32.mrf.mxu0 }
  0xc4   :  { %v105_v24 = vadd.f32 %v104_v22, %v32_v21 }
  0xc5   :  { %v238_v25 = vpop.f32.mrf.mxu0 }
  0xc6   :  { %v115_v26 = vadd.f32 %v214_v23, %v105_v24 }
  0xc8   :  { %v116_v27 = vmin.f32 %v115_v26, 0.0 }
  0xca   :  { %v117_v28 = vmul.f32 1.442695, %v116_v27 }
  0xcc   :  { %278 = vpow2.f32 %v117_v28 }
  0xd9   :  { %v279_v29 = vpop.eup %278 }
  0xda   :  { %272 = vmatmul.mubr.f32.vlgmr.msra.gmra.mxu1 %v279_v29 }
 0x19a   :  { %v202_v31 = vpop.f32.mrf.mxu1 }
 0x19b   :  { %v206_v32 = vadd.f32 %v202_v31, %v119_v30 }
 0x19c   :  { %v273_v33 = vpop.f32.mrf.mxu1 }
 0x19d   :  { %208 = vst.msk [vmem:[%s408_s5] sm:$0xff] %vm24_vm2, %v206_v32 }

</bundles_post_ra>
